<compile_context>
chip_gen: v7x
topology: tpu7x:2x2x1
jax: 0.10.0
libtpu: 0.0.40
codegen_flags: <defaults>
</compile_context>

<pallas_src>
import functools

import jax
import jax.numpy as jnp
from jax.experimental import pallas as pl
from jax.experimental.pallas import tpu as pltpu


# ---------------------------------------------------------------------------
# Kernels
# ---------------------------------------------------------------------------
def _mlp2_kernel(x_ref, w1_ref, b1_ref, w2_ref, b2_ref, o_ref):
    # Fused 2-layer MLP on one row tile: (x @ W1t + b1) @ W2t + b2 (f32 acc).
    h = jnp.dot(x_ref[...], w1_ref[...], preferred_element_type=jnp.float32)
    h = h + b1_ref[...]                       # (1, H) bias broadcasts
    y = jnp.dot(h.astype(w2_ref.dtype), w2_ref[...],
                preferred_element_type=jnp.float32)
    y = y + b2_ref[...]
    o_ref[...] = y.astype(o_ref.dtype)


def _linear_kernel(x_ref, w_ref, b_ref, o_ref):
    # One (row tile, out tile) block of a single linear layer: x @ Wt + b.
    y = jnp.dot(x_ref[...], w_ref[...], preferred_element_type=jnp.float32)
    y = y + b_ref[...]
    o_ref[...] = y.astype(o_ref.dtype)


# ---------------------------------------------------------------------------
# Helpers
# ---------------------------------------------------------------------------
def _round_up(x, m):
    return ((x + m - 1) // m) * m


def _sublane(dtype):
    # Native sublane pack: 8 for f32, 16 for bf16, 32 for int8/fp8.
    itemsize = jnp.dtype(dtype).itemsize
    return 8 * max(1, 4 // itemsize)


def _vmem_capacity_bytes():
    try:
        cap = int(pltpu.get_tpu_info().vmem_capacity_bytes)
        if cap > 0:
            return cap
    except Exception:
        pass
    return 64 << 20   # conservative default: v7x per-TensorCore VMEM


def _tile_budget(cap):
    # ~2/5 of physical VMEM: ~25 MiB on v7x (64 MiB), ~51 MiB on v5e/v6e (128).
    return max(16 << 20, (cap * 2) // 5)


def _vmem_limit(cap, need):
    return int(min(cap * 17 // 20, max(need + (8 << 20), 32 << 20)))


# ---------------------------------------------------------------------------
# pallas_call builders
# ---------------------------------------------------------------------------
def _linear_call(x2d, wT, b, cap):
    """Single linear layer, tiled over rows and (if needed) the out dim."""
    dtype = x2d.dtype
    itemsize = jnp.dtype(dtype).itemsize
    M, K = x2d.shape
    N = wT.shape[1]
    sub = _sublane(dtype)
    budget = _tile_budget(cap)

    # Out-dim tile: whole N if the (double-buffered) weight tile fits in ~45%
    # of the budget, otherwise a 128-multiple streamed over a second grid axis.
    def w_bytes(tn):
        return 2 * (K + 1) * tn * itemsize          # x2: Pallas double-buffers

    if w_bytes(N) <= budget * 45 // 100:
        tn = N
    else:
        tn = _round_up(N, 128)
        while tn > 128 and w_bytes(tn) > budget * 45 // 100:
            tn = _round_up(tn // 2, 128)
    num_n = pl.cdiv(N, tn)

    # Row tile with the remaining budget (x / out streams, double-buffered).
    per_row = 2 * (K + tn) * itemsize
    left = max(budget - w_bytes(tn), sub * per_row)
    tm = 1024
    while tm > sub and tm * per_row > left:
        tm //= 2
    tm = max(sub, min(tm, _round_up(max(M, 1), sub)))
    num_m = pl.cdiv(M, tm)

    need = w_bytes(tn) + tm * per_row
    compiler_params = pltpu.CompilerParams(
        dimension_semantics=("parallel", "parallel"),
        vmem_limit_bytes=_vmem_limit(cap, need),
    )

    return pl.pallas_call(
        _linear_kernel,
        out_shape=jax.ShapeDtypeStruct((M, N), dtype),
        grid_spec=pltpu.PrefetchScalarGridSpec(
            num_scalar_prefetch=0,
            # n outer / m inner: each weight tile is DMA'd once and reused for
            # every row tile; x blocks are only re-fetched num_n times.
            grid=(num_n, num_m),
            in_specs=[
                pl.BlockSpec((tm, K), lambda nj, mi: (mi, 0)),   # streamed x
                pl.BlockSpec((K, tn), lambda nj, mi: (0, nj)),   # weight tile
                pl.BlockSpec((1, tn), lambda nj, mi: (0, nj)),   # bias tile
            ],
            out_specs=pl.BlockSpec((tm, tn), lambda nj, mi: (mi, nj)),
        ),
        compiler_params=compiler_params,
        cost_estimate=pl.CostEstimate(
            flops=2 * M * K * N, transcendentals=0,
            bytes_accessed=(M * K + K * N + N + M * N) * itemsize),
    )(x2d, wT, b.reshape(1, N))


def _fused_call_or_none(x2d, w1T, b1, w2T, b2, cap):
    """Fused 2-layer MLP with VMEM-resident weights; None if it doesn't fit."""
    dtype = x2d.dtype
    itemsize = jnp.dtype(dtype).itemsize
    M, K = x2d.shape
    H = w1T.shape[1]
    N = w2T.shape[1]
    sub = _sublane(dtype)
    budget = _tile_budget(cap)

    # Residents are still double-buffered by the Pallas pipeline -> charge x2.
    weight_bytes = 2 * (K * H + H + H * N + N) * itemsize
    per_row = 2 * (K + N) * itemsize + H * 4         # streamed x/out + f32 h
    left = budget - weight_bytes
    if left < sub * per_row:
        return None                                   # -> two-pass fallback

    tm = 1024
    while tm > sub and tm * per_row > left:
        tm //= 2
    tm = max(sub, min(tm, _round_up(max(M, 1), sub)))
    if tm < min(256, _round_up(max(M, 1), sub)):
        return None          # tiny row tiles: per-step overhead dominates

    num_m = pl.cdiv(M, tm)
    need = weight_bytes + tm * per_row
    compiler_params = pltpu.CompilerParams(
        dimension_semantics=("parallel",),            # rows across v7x TCs
        vmem_limit_bytes=_vmem_limit(cap, need),
    )

    return pl.pallas_call(
        _mlp2_kernel,
        out_shape=jax.ShapeDtypeStruct((M, N), dtype),
        grid_spec=pltpu.PrefetchScalarGridSpec(
            num_scalar_prefetch=0,
            grid=(num_m,),
            in_specs=[
                pl.BlockSpec((tm, K), lambda i: (i, 0)),     # streamed x
                pl.BlockSpec((K, H), lambda i: (0, 0)),      # resident W1
                pl.BlockSpec((1, H), lambda i: (0, 0)),      # resident b1
                pl.BlockSpec((H, N), lambda i: (0, 0)),      # resident W2
                pl.BlockSpec((1, N), lambda i: (0, 0)),      # resident b2
            ],
            out_specs=pl.BlockSpec((tm, N), lambda i: (i, 0)),
        ),
        compiler_params=compiler_params,
        cost_estimate=pl.CostEstimate(
            flops=2 * M * (K * H + H * N), transcendentals=0,
            bytes_accessed=(M * K + K * H + H + H * N + N + M * N) * itemsize),
    )(x2d, w1T, b1.reshape(1, H), w2T, b2.reshape(1, N))


# ---------------------------------------------------------------------------
# Forward wrapper
# ---------------------------------------------------------------------------
def projector_forward(x, params, skip_first=False):
    """x: [..., in_dims] (or [..., hidden_dims] if skip_first) -> [..., out_dims]."""
    w1t, b1, w2t, b2 = params["w1t"], params["b1"], params["w2t"], params["b2"]
    in_dims, hidden_dims = w1t.shape
    out_dims = w2t.shape[1]

    lead = x.shape[:-1]
    feat = x.shape[-1]
    expected = hidden_dims if skip_first else in_dims
    assert feat == expected, f"expected feature dim {expected}, got {feat}"

    x2d = x.reshape(-1, feat)
    cap = _vmem_capacity_bytes()

    if skip_first:
        y2d = _linear_call(x2d, w2t, b2, cap)
    else:
        y2d = _fused_call_or_none(x2d, w1t, b1, w2t, b2, cap)
        if y2d is None:
            # Residents don't fit comfortably in VMEM: run two N-tiled linear
            # passes (intermediate h round-trips HBM, but nothing spills).
            h2d = _linear_call(x2d, w1t, b1, cap)
            y2d = _linear_call(h2d, w2t, b2, cap)

    return y2d.reshape(*lead, out_dims)


def init_projector_params(key, in_dims, hidden_dims, out_dims,
                          dtype=jnp.float32):
    """Deterministic init matching nn.Linear's U(-1/sqrt(fan_in), 1/sqrt(fan_in))."""
    k1, k2, k3, k4 = jax.random.split(key, 4)
    bound1 = 1.0 / jnp.sqrt(in_dims)
    bound2 = 1.0 / jnp.sqrt(hidden_dims)
    # nn.Linear weight is (out, in); we store the transpose for the kernel.
    w1 = jax.random.uniform(k1, (hidden_dims, in_dims), dtype, -bound1, bound1)
    b1 = jax.random.uniform(k2, (hidden_dims,), dtype, -bound1, bound1)
    w2 = jax.random.uniform(k3, (out_dims, hidden_dims), dtype, -bound2, bound2)
    b2 = jax.random.uniform(k4, (out_dims,), dtype, -bound2, bound2)
    return {"w1t": w1.T, "b1": b1, "w2t": w2.T, "b2": b2}


if __name__ == "__main__":
    in_dims, hidden_dims, out_dims = 32, 64, 16
    batch, seq = 2, 8

    key = jax.random.PRNGKey(0)
    kx, kp = jax.random.split(key)
    params = init_projector_params(kp, in_dims, hidden_dims, out_dims)

    x = jax.random.normal(kx, (batch, seq, in_dims), jnp.float32)

    # Pallas kernel path (skip_first=False)
    fwd = jax.jit(functools.partial(projector_forward, skip_first=False))
    y = jax.block_until_ready(fwd(x, params))

    # Reference (plain JAX)
    ref = (x.reshape(-1, in_dims) @ params["w1t"] + params["b1"]) \
        @ params["w2t"] + params["b2"]
    ref = ref.reshape(batch, seq, out_dims)
    assert y.shape == (batch, seq, out_dims)
    assert jnp.allclose(y, ref, atol=1e-4, rtol=1e-4)

    # skip_first=True path: input already has hidden_dims features
    x_h = jax.random.normal(kx, (batch, seq, hidden_dims), jnp.float32)
    fwd_skip = jax.jit(functools.partial(projector_forward, skip_first=True))
    y2 = jax.block_until_ready(fwd_skip(x_h, params))
    ref2 = (x_h.reshape(-1, hidden_dims) @ params["w2t"] + params["b2"]
            ).reshape(batch, seq, out_dims)
    assert jnp.allclose(y2, ref2, atol=1e-4, rtol=1e-4)

    print("KERNEL_OK")
</pallas_src>

<mosaic_0001>
module attributes {stable_mosaic.version = 11 : i64} {
  func.func @_mlp2_kernel(%arg0: i32, %arg1: memref<16x32xf32, #tpu.memory_space<vmem>>, %arg2: memref<32x64xf32, #tpu.memory_space<vmem>>, %arg3: memref<1x64xf32, #tpu.memory_space<vmem>>, %arg4: memref<64x16xf32, #tpu.memory_space<vmem>>, %arg5: memref<1x16xf32, #tpu.memory_space<vmem>>, %arg6: memref<16x16xf32, #tpu.memory_space<vmem>>) attributes {dimension_semantics = [#tpu.dimension_semantics<parallel>], iteration_bounds = array<i64: 1>, scalar_prefetch = 0 : i64, scratch_operands = 0 : i64, tpu.core_type = #tpu.core_type<tc>, window_params = [{transform_indices = @transform_0, window_bounds = array<i64: 16, 32>}, {pipeline_mode = #tpu.pipeline_mode<synchronous>, transform_indices = @transform_1, window_bounds = array<i64: 32, 64>}, {pipeline_mode = #tpu.pipeline_mode<synchronous>, transform_indices = @transform_2, window_bounds = array<i64: 1, 64>}, {pipeline_mode = #tpu.pipeline_mode<synchronous>, transform_indices = @transform_3, window_bounds = array<i64: 64, 16>}, {pipeline_mode = #tpu.pipeline_mode<synchronous>, transform_indices = @transform_4, window_bounds = array<i64: 1, 16>}, {transform_indices = @transform_5, window_bounds = array<i64: 16, 16>}]} {
    %c0 = arith.constant 0 : index
    %c0_0 = arith.constant 0 : index
    %0 = vector.load %arg1[%c0, %c0_0] : memref<16x32xf32, #tpu.memory_space<vmem>>, vector<16x32xf32>
    %c0_1 = arith.constant 0 : index
    %c0_2 = arith.constant 0 : index
    %1 = vector.load %arg2[%c0_1, %c0_2] : memref<32x64xf32, #tpu.memory_space<vmem>>, vector<32x64xf32>
    %cst = arith.constant dense<0.000000e+00> : vector<16x64xf32>
    %2 = tpu.matmul %0, %1, %cst {dimension_numbers = #tpu.dot_dimension_numbers<[1], [0], [0], [1], [0, 0, 1, 1], [], []>} : vector<16x32xf32>, vector<32x64xf32>, vector<16x64xf32> -> vector<16x64xf32>
    %c0_3 = arith.constant 0 : index
    %c0_4 = arith.constant 0 : index
    %3 = vector.load %arg3[%c0_3, %c0_4] : memref<1x64xf32, #tpu.memory_space<vmem>>, vector<1x64xf32>
    %4 = vector.broadcast %3 : vector<1x64xf32> to vector<16x64xf32>
    %5 = arith.addf %2, %4 : vector<16x64xf32>
    %c0_5 = arith.constant 0 : index
    %c0_6 = arith.constant 0 : index
    %6 = vector.load %arg4[%c0_5, %c0_6] : memref<64x16xf32, #tpu.memory_space<vmem>>, vector<64x16xf32>
    %cst_7 = arith.constant dense<0.000000e+00> : vector<16x16xf32>
    %7 = tpu.matmul %5, %6, %cst_7 {dimension_numbers = #tpu.dot_dimension_numbers<[1], [0], [0], [1], [0, 0, 1, 1], [], []>} : vector<16x64xf32>, vector<64x16xf32>, vector<16x16xf32> -> vector<16x16xf32>
    %c0_8 = arith.constant 0 : index
    %c0_9 = arith.constant 0 : index
    %8 = vector.load %arg5[%c0_8, %c0_9] : memref<1x16xf32, #tpu.memory_space<vmem>>, vector<1x16xf32>
    %9 = vector.broadcast %8 : vector<1x16xf32> to vector<16x16xf32>
    %10 = arith.addf %7, %9 : vector<16x16xf32>
    %c0_10 = arith.constant 0 : index
    %c0_11 = arith.constant 0 : index
    %11 = vector.load %arg6[%c0_10, %c0_11] : memref<16x16xf32, #tpu.memory_space<vmem>>, vector<16x16xf32>
    tpu.vector_store %arg6[%c0_10, %c0_11], %10 {strides = array<i32>} : memref<16x16xf32, #tpu.memory_space<vmem>>, vector<16x16xf32>,
    return
  }
  func.func @transform_0(%arg0: i32) -> (i32, i32) {
    %c0_i32 = arith.constant 0 : i32
    %c0_i32_0 = arith.constant 0 : i32
    return %arg0, %c0_i32 : i32, i32
  }
  func.func @transform_1(%arg0: i32) -> (i32, i32) {
    %c0_i32 = arith.constant 0 : i32
    %c0_i32_0 = arith.constant 0 : i32
    %c0_i32_1 = arith.constant 0 : i32
    return %c0_i32, %c0_i32_0 : i32, i32
  }
  func.func @transform_2(%arg0: i32) -> (i32, i32) {
    %c0_i32 = arith.constant 0 : i32
    %c0_i32_0 = arith.constant 0 : i32
    %c0_i32_1 = arith.constant 0 : i32
    return %c0_i32, %c0_i32_0 : i32, i32
  }
  func.func @transform_3(%arg0: i32) -> (i32, i32) {
    %c0_i32 = arith.constant 0 : i32
    %c0_i32_0 = arith.constant 0 : i32
    %c0_i32_1 = arith.constant 0 : i32
    return %c0_i32, %c0_i32_0 : i32, i32
  }
  func.func @transform_4(%arg0: i32) -> (i32, i32) {
    %c0_i32 = arith.constant 0 : i32
    %c0_i32_0 = arith.constant 0 : i32
    %c0_i32_1 = arith.constant 0 : i32
    return %c0_i32, %c0_i32_0 : i32, i32
  }
  func.func @transform_5(%arg0: i32) -> (i32, i32) {
    %c0_i32 = arith.constant 0 : i32
    %c0_i32_0 = arith.constant 0 : i32
    return %arg0, %c0_i32 : i32, i32
  }
}

</mosaic_0001>

<bundles_post_ra>
// kernel: projector_forward.1
= control target key start
LH: loop header
LB: loop body
LE: loop exit
PB: predicated region body
PF: predicated region fallthrough
CT: control target
= control target key end

     0   :  { %vm34_vm0 = vcmask 261120   ;;  %s430_s0 = inlined_call_operand.vmem [shape: f32[16,32], index: 0, kind: input, shape index: {}]   ;;  %s431_s1 = inlined_call_operand.vmem [shape: f32[32,64], index: 1, kind: input, shape index: {}]   ;;  %s432_s2 = inlined_call_operand.vmem [shape: f32[1,64], index: 2, kind: input, shape index: {}]   ;;  %s433_s3 = inlined_call_operand.vmem [shape: f32[64,16], index: 3, kind: input, shape index: {}]   ;;  %s434_s4 = inlined_call_operand.vmem [shape: f32[1,16], index: 4, kind: input, shape index: {}]   ;;  %s435_s5 = inlined_call_operand.hbm [shape: f32[16,16], index: 5, kind: output, shape index: {}]  }
   0x1   :  { %v23_v0 = vld [vmem:[%s431_s1] sm:$0xff]  ;;  %v24_v1 = vld [vmem:[%s431_s1 + $0x8] sm:$0xff]  ;;  %v25_v2 = vld [vmem:[%s431_s1 + $0x10] sm:$0xff] }
   0x2   :  { %v284_v3 = vpack.c.bf16 %v24_v1, %v23_v0  ;;  %v26_v4 = vld [vmem:[%s431_s1 + $0x18] sm:$0xff]  ;;  %v21_v5 = vld [vmem:[%s430_s0] sm:$0xff]  ;;  %v117_v8 = vld [vmem:[%s433_s3 + $0x8] sm:$0xff] }
   0x3   :  { %v288_v6 = vpack.c.bf16 %v26_v4, %v25_v2  ;;  %262 = vmatprep.mubr.msk.f32.mxu0 %vm34_vm0, %v21_v5  ;;  %v116_v7 = vld [vmem:[%s433_s3] sm:$0xff]  ;;  %v118_v9 = vld [vmem:[%s433_s3 + $0x10] sm:$0xff]  ;;  %v119_v11 = vld [vmem:[%s433_s3 + $0x18] sm:$0xff] }
   0x4   :  { %285 = vmatprep.subr.bf16.mxu0 %v284_v3  ;;  %v292_v10 = vpack.c.bf16 %v117_v8, %v116_v7  ;;  %v296_v12 = vpack.c.bf16 %v119_v11, %v118_v9  ;;  %v120_v13 = vld [vmem:[%s433_s3 + $0x20] sm:$0xff]  ;;  %v121_v14 = vld [vmem:[%s433_s3 + $0x28] sm:$0xff] }
   0x5   :  { %287 = vmatpush3.bf16.msra.mxu0 %v284_v3 }
   0x6   :  { %10 = vsyncpa [#allocation3], 0  ;;  %289 = vmatprep.subr.bf16.mxu0 %v288_v6  ;;  %293 = vmatprep.subr.bf16.mxu1 %v292_v10  ;;  %v300_v15 = vpack.c.bf16 %v121_v14, %v120_v13  ;;  %v22_v16 = vld [vmem:[%s430_s0 + $0x8] sm:$0xff]  ;;  %v122_v17 = vld [vmem:[%s433_s3 + $0x30] sm:$0xff]  ;;  %vm131_vm1 = vcmask 523264   ;;  %s335_s23 = smov [#allocation2]  }
   0x7   :  { %295 = vmatpush3.bf16.msra.mxu1 %v292_v10  ;;  %v123_v18 = vld [vmem:[%s433_s3 + $0x38] sm:$0xff]  ;;  %v232_v20 = vld [vmem:[%s432_s2] ss:$0 sm:$0xff]  ;;  %s221_s3 = sshll.u32 %s335_s23, 4  ;;  %vm213_vm2 = vcmask 130048   ;;  %s222_s3 = int_to_ptr.vmem [resolvable:$true] %s221_s3 }
   0x8   :  { %297 = vmatprep.subr.bf16.mxu1 %v296_v12  ;;  %v304_v19 = vpack.c.bf16 %v123_v18, %v122_v17  ;;  %v235_v25 = vld [vmem:[%s434_s4] ss:$0 sm:$0xff]  ;;  %s311_s2 = scalar_lea.vmem %s222_s3, 256  ;;  %p316_p1 = scmp.lt.s32.totalorder %s222_s3, %s222_s3 }
   0x9   :  { %291 = vmatpush3.bf16.msra.mxu0 %v288_v6  ;;  %p312_p0 = scmp.ne.s32.totalorder %s222_s3, %s311_s2  ;;  %p317_p2 = scmp.lt.s32.totalorder %s311_s2, %s311_s2 }
   0xb   :  { %299 = vmatpush3.bf16.msra.mxu1 %v296_v12  ;;  %p318_p3 = por %p317_p2, %p316_p1 }
   0xc   :  { %263 = vmatmul.mubr.msk.f32.vlgmr.msra.gmra.mrb[0].mxu0 %vm34_vm0, %v22_v16  ;;  %301 = vmatprep.subr.bf16.mxu1 %v300_v15 }
   0xd   :  { %p319_p4 = pnand %p318_p3, %p312_p0 }
   0xf   :  { %303 = vmatpush3.bf16.msra.mxu1 %v300_v15 }
  0x10   :  { %305 = vmatprep.subr.bf16.mxu1 %v304_v19 }
  0x13   :  { %307 = vmatpush3.bf16.msra.mxu1 %v304_v19 }
  0xdf   :  { %v264_v21 = vpop.f32.mrb[0].mxu0 }
  0xe0   :  { %v107_v22 = vpop.f32.mrb[1].mxu0  ;;  %v113_v24 = vadd.f32 %v264_v21, %v232_v20 }
  0xe1   :  { %v108_v23 = vadd.f32 %v232_v20, %v107_v22 }
  0xe3   :  { %281 = vmatprep.mubr.msk.f32.mxu1 %vm131_vm1, %v108_v23 }
  0xe4   :  { %282 = vmatmul.mubr.msk.f32.vlgmr.msra.gmra.mrb[0].mxu1 %vm131_vm1, %v113_v24 }
 0x1b7   :  { %v283_v26 = vpop.f32.mrb[0].mxu1 }
 0x1b8   :  { %v210_v27 = vadd.f32 %v283_v26, %v235_v25  ;;  %v204_v28 = vpop.f32.mrb[1].mxu1 }
 0x1b9   :  { %v205_v29 = vadd.f32 %v235_v25, %v204_v28 }
 0x1ba   :  { %215 = vst.msk [vmem:[#allocation2 + $0x8] sm:$0xff] %vm213_vm2, %v210_v27 }
 0x1bb   :  { %214 = vst.msk [vmem:[#allocation2] sm:$0xff] %vm213_vm2, %v205_v29 }
 0x1bc   :  { %322 = shalt.err (!%p319_p4)
}
 0x1bd   :  { %s323_s4 = scalar_lea.hbm %s435_s5, 256 }
 0x1be   :  { %p324_p5 = scmp.ne.s32.totalorder %s435_s5, %s323_s4  ;;  %p327_p6 = scmp.lt.u32.totalorder %s323_s4, %s435_s5 }
 0x1c0   :  { %p329_p7 = pnand %p327_p6, %p324_p5 }
 0x1c2   :  { %332 = shalt.err (!%p329_p7)
}
 0x1c3   :  { %s336_s30 = smov 128   ;;  %s337_s6 = smov 8  }
 0x1c4   :  { %227 = dma.vmem_to_hbm [thread:$0]  %s222_s3, 256, %s435_s5, [#allocation3], %s336_s30, %s336_s30, %s337_s6  }
 0x1c5   :  { %333 = dma.done.wait [#allocation3], 256  }
 0x1c6   :  { %334 = vsyncadd [#allocation3], 4294967040 }
 0x1c7   :  { %231 = vsyncpa [#allocation3], 1 }

</bundles_post_ra>
